<compile_context>
chip_gen: v7x
topology: tpu7x:2x2x1
jax: 0.10.0
libtpu: 0.0.40
codegen_flags: <defaults>
</compile_context>

<pallas_src>
import functools

import jax
import jax.numpy as jnp
from jax.experimental import pallas as pl
from jax.experimental.pallas import tpu as pltpu


_TARGET_BLOCK_BYTES = 2 << 20   # ~2 MiB / buffer: HBM roofline already saturated
_VMEM_LIMIT_BYTES = 32 << 20    # conservative scoped limit (fits v7x 64 MiB/TC)
_MIN_GRID_STEPS = 16            # keep pipeline busy; lets v7x shard across 2 TCs


def _round_up(x, m):
    return ((x + m - 1) // m) * m


def _pillar_mean_lane_kernel(x_ref, o_ref, *, n_points, c):
    """x_ref: (TP, n_points*c) lane-dense block; o_ref: (TP, c)."""
    # Per-slice f32 accumulation: the upcast happens on (TP, c) slices only,
    # never on the full block, so peak VMEM stays at ~1 input block.
    # Partial last grid block: out-of-bounds pillar rows hold garbage, but the
    # reduction is per-row (points axis only) and the output store is masked.
    acc = x_ref[:, pl.ds(0, c)].astype(jnp.float32)
    for k in range(1, n_points):
        acc = acc + x_ref[:, pl.ds(k * c, c)].astype(jnp.float32)
    o_ref[...] = (acc * (1.0 / n_points)).astype(o_ref.dtype)


def _pillar_mean_3d_kernel(x_ref, o_ref):
    """x_ref: (TP, n_points, C) with C % 128 == 0 (already lane-dense)."""
    s = jnp.sum(x_ref[...], axis=1, dtype=jnp.float32)  # cast folded into reduce
    o_ref[...] = (s * (1.0 / x_ref.shape[1])).astype(o_ref.dtype)


def pillar_mean(point_features, max_tile_pillars=None):
    """Per-pillar mean over the points axis, computed in a Pallas kernel."""
    n_pillars, n_points, c = point_features.shape
    dtype = point_features.dtype
    itemsize = jnp.dtype(dtype).itemsize

    # dtype-dependent sublane multiple (8 for f32, 16 for bf16, 32 for int8).
    packing = max(1, 4 // itemsize)
    sublane = 8 * packing

    lane_dense = (c % 128) != 0
    if lane_dense:
        in_row_bytes = _round_up(n_points * c, 128) * itemsize
    else:
        in_row_bytes = _round_up(n_points, sublane) * c * itemsize
    out_row_bytes = _round_up(c, 128) * itemsize
    per_pillar_bytes = in_row_bytes + out_row_bytes

    # --- tile sizing: ~2 MiB blocks, >= ~16 grid steps, sublane-rounded. ---
    tile = max(sublane,
               (_TARGET_BLOCK_BYTES // per_pillar_bytes) // sublane * sublane)
    min_step_tile = _round_up(-(-n_pillars // _MIN_GRID_STEPS), sublane)
    tile = min(tile, min_step_tile)                      # grid >= ~16 steps
    tile = min(tile, _round_up(n_pillars, sublane))      # never exceed problem
    if max_tile_pillars is not None:
        tile = min(tile, max(sublane,
                             (int(max_tile_pillars) // sublane) * sublane))
    tile = max(sublane, tile)

    grid = pl.cdiv(n_pillars, tile)

    if lane_dense:
        x = point_features.reshape(n_pillars, n_points * c)   # free reshape
        kernel = functools.partial(_pillar_mean_lane_kernel,
                                   n_points=n_points, c=c)
        in_specs = [pl.BlockSpec((tile, n_points * c), lambda i: (i, 0))]
    else:
        x = point_features
        kernel = _pillar_mean_3d_kernel
        in_specs = [pl.BlockSpec((tile, n_points, c), lambda i: (i, 0, 0))]

    cost = pl.CostEstimate(
        flops=n_pillars * n_points * c + n_pillars * c,
        transcendentals=0,
        bytes_accessed=(n_pillars * n_points * c + n_pillars * c) * itemsize,
    )

    # NOTE: pipeline_mode=pl.Buffered(3) on the input spec is an optional
    # follow-up if profiling shows exposed DMA with these small blocks.
    return pl.pallas_call(
        kernel,
        out_shape=jax.ShapeDtypeStruct((n_pillars, c), dtype),
        grid_spec=pltpu.PrefetchScalarGridSpec(
            num_scalar_prefetch=0,
            grid=(grid,),
            in_specs=in_specs,
            out_specs=pl.BlockSpec((tile, c), lambda i: (i, 0)),
        ),
        compiler_params=pltpu.CompilerParams(
            dimension_semantics=("parallel",),
            vmem_limit_bytes=_VMEM_LIMIT_BYTES,
        ),
        cost_estimate=cost,
    )(x)


class CustomPointScatter:
    """JAX/Pallas port of v2xvit CustomPointScatter (no learnable parameters)."""

    def __init__(self, grid_size, c_bev, batch_size=None):
        self.nx, self.ny, self.nz = grid_size
        assert self.nz == 1
        self.c_bev = c_bev
        self.batch_size = batch_size  # pass statically to avoid a host sync

    def __call__(self, point_features, voxel_coords, batch_size=None):
        """
        point_features: [N_pillars, N_points, C_point]  (float)
        voxel_coords:   [N_pillars, 4] -> [batch_idx, z, y, x]  (int)
        returns:        [B, C_bev, H, W]  (NCHW, same dtype as point_features)
        """
        n_pillars, n_points, c = point_features.shape
        b = batch_size if batch_size is not None else self.batch_size
        if b is None:
            # Torch reference derives B from data (blocking host round-trip).
            b = int(jax.device_get(jnp.max(voxel_coords[:, 0]))) + 1
        b = int(b)
        h, w = int(self.ny), int(self.nx)

        # Hot path: per-pillar mean reduction in the Pallas kernel.
        pillar_bev = pillar_mean(point_features)            # [N_pillars, C]

        # Scatter into an NHWC canvas (each pillar writes C contiguous values),
        # then one dense transpose to the reference NCHW layout.  This replaces
        # C strided single-element writes per pillar into an NCHW canvas.
        # Note: duplicate (b, y, x) coords pick an arbitrary winner, matching
        # the usual assumption that voxel coordinates are unique per batch.
        # TODO(synk): fuse this data-dependent per-pillar scatter into the
        #             Pallas kernel (scalar-prefetched linearized indices +
        #             aliased, pre-zeroed HBM output); left in plain JAX.
        bi = voxel_coords[:, 0].astype(jnp.int32)
        yi = voxel_coords[:, 2].astype(jnp.int32)
        xi = voxel_coords[:, 3].astype(jnp.int32)
        canvas = jnp.zeros((b, h, w, c), dtype=point_features.dtype)
        canvas = canvas.at[bi, yi, xi, :].set(pillar_bev)
        return jnp.transpose(canvas, (0, 3, 1, 2))          # [B, C, H, W]


if __name__ == "__main__":
    key = jax.random.PRNGKey(0)
    k_feat, k_loc, k_big, k_bf, k_wide = jax.random.split(key, 5)

    # ---- Test 1: full module forward at small, module-consistent shapes. ----
    nx, ny, nz = 16, 16, 1          # grid_size (W = nx, H = ny)
    c_point = 32                     # channels per point == C_bev of the output
    n_pillars, n_points = 20, 8
    batch = 2

    point_features = jax.random.normal(
        k_feat, (n_pillars, n_points, c_point), dtype=jnp.float32)

    # Unique (y, x) locations; alternate batch indices so B = 2.
    loc = jax.random.permutation(k_loc, ny * nx)[:n_pillars]
    b_idx = (jnp.arange(n_pillars) % batch).astype(jnp.int32)
    y_idx = (loc // nx).astype(jnp.int32)
    x_idx = (loc % nx).astype(jnp.int32)
    voxel_coords = jnp.stack(
        [b_idx, jnp.zeros_like(b_idx), y_idx, x_idx], axis=1)

    scatter = CustomPointScatter((nx, ny, nz), c_point, batch_size=batch)
    out = scatter(point_features, voxel_coords)
    out = jax.block_until_ready(out)

    ref_mean = jnp.mean(point_features, axis=1)
    ref = jnp.zeros((batch, c_point, ny, nx), dtype=jnp.float32)
    ref = ref.at[b_idx, :, y_idx, x_idx].set(ref_mean)

    assert out.shape == (batch, c_point, ny, nx), out.shape
    assert out.dtype == point_features.dtype
    assert jnp.allclose(out, ref, atol=1e-5, rtol=1e-5)

    # ---- Test 2: multi-step grid with a partial last block (no padding). ----
    n_pillars2, n_points2, c2 = 300, 16, 64
    x_big = jax.random.normal(
        k_big, (n_pillars2, n_points2, c2), dtype=jnp.float32)
    got = jax.block_until_ready(pillar_mean(x_big, max_tile_pillars=128))
    want = jnp.mean(x_big, axis=1)
    assert got.shape == want.shape
    assert jnp.allclose(got, want, atol=1e-5, rtol=1e-5)

    # ---- Test 3: bf16 input (sublane=16 tiles, per-slice f32 accumulation). --
    x_bf = jax.random.normal(k_bf, (100, 8, 32), dtype=jnp.bfloat16)
    got_bf = jax.block_until_ready(pillar_mean(x_bf))
    want_bf = jnp.mean(x_bf.astype(jnp.float32), axis=1).astype(jnp.bfloat16)
    assert got_bf.dtype == jnp.bfloat16
    assert jnp.allclose(got_bf.astype(jnp.float32), want_bf.astype(jnp.float32),
                        atol=2e-2, rtol=2e-2)

    # ---- Test 4: C % 128 == 0 path (3-D block, jnp.sum with f32 accum). ----
    x_wide = jax.random.normal(k_wide, (40, 8, 128), dtype=jnp.float32)
    got_w = jax.block_until_ready(pillar_mean(x_wide))
    want_w = jnp.mean(x_wide, axis=1)
    assert jnp.allclose(got_w, want_w, atol=1e-5, rtol=1e-5)

    print("KERNEL_OK")
</pallas_src>

<mosaic_0001>
module attributes {stable_mosaic.version = 11 : i64} {
  func.func @_pillar_mean_lane_kernel(%arg0: i32, %arg1: memref<8x256xf32, #tpu.memory_space<vmem>>, %arg2: memref<8x32xf32, #tpu.memory_space<vmem>>) attributes {dimension_semantics = [#tpu.dimension_semantics<parallel>], iteration_bounds = array<i64: 3>, scalar_prefetch = 0 : i64, scratch_operands = 0 : i64, tpu.core_type = #tpu.core_type<tc>, window_params = [{transform_indices = @transform_0, window_bounds = array<i64: 8, 256>}, {transform_indices = @transform_1, window_bounds = array<i64: 8, 32>}]} {
    %c0 = arith.constant 0 : index
    %c0_0 = arith.constant 0 : index
    %0 = vector.load %arg1[%c0, %c0_0] : memref<8x256xf32, #tpu.memory_space<vmem>>, vector<8x32xf32>
    %c0_1 = arith.constant 0 : index
    %c32 = arith.constant 32 : index
    %1 = vector.load %arg1[%c0_1, %c32] : memref<8x256xf32, #tpu.memory_space<vmem>>, vector<8x32xf32>
    %2 = arith.addf %0, %1 : vector<8x32xf32>
    %c0_2 = arith.constant 0 : index
    %c64 = arith.constant 64 : index
    %3 = vector.load %arg1[%c0_2, %c64] : memref<8x256xf32, #tpu.memory_space<vmem>>, vector<8x32xf32>
    %4 = arith.addf %2, %3 : vector<8x32xf32>
    %c0_3 = arith.constant 0 : index
    %c96 = arith.constant 96 : index
    %5 = vector.load %arg1[%c0_3, %c96] : memref<8x256xf32, #tpu.memory_space<vmem>>, vector<8x32xf32>
    %6 = arith.addf %4, %5 : vector<8x32xf32>
    %c0_4 = arith.constant 0 : index
    %c128 = arith.constant 128 : index
    %7 = vector.load %arg1[%c0_4, %c128] : memref<8x256xf32, #tpu.memory_space<vmem>>, vector<8x32xf32>
    %8 = arith.addf %6, %7 : vector<8x32xf32>
    %c0_5 = arith.constant 0 : index
    %c160 = arith.constant 160 : index
    %9 = vector.load %arg1[%c0_5, %c160] : memref<8x256xf32, #tpu.memory_space<vmem>>, vector<8x32xf32>
    %10 = arith.addf %8, %9 : vector<8x32xf32>
    %c0_6 = arith.constant 0 : index
    %c192 = arith.constant 192 : index
    %11 = vector.load %arg1[%c0_6, %c192] : memref<8x256xf32, #tpu.memory_space<vmem>>, vector<8x32xf32>
    %12 = arith.addf %10, %11 : vector<8x32xf32>
    %c0_7 = arith.constant 0 : index
    %c224 = arith.constant 224 : index
    %13 = vector.load %arg1[%c0_7, %c224] : memref<8x256xf32, #tpu.memory_space<vmem>>, vector<8x32xf32>
    %14 = arith.addf %12, %13 : vector<8x32xf32>
    %cst = arith.constant 1.250000e-01 : f32
    %15 = vector.broadcast %cst : f32 to vector<8x32xf32>
    %16 = arith.mulf %14, %15 : vector<8x32xf32>
    %c0_8 = arith.constant 0 : index
    %c0_9 = arith.constant 0 : index
    %17 = vector.load %arg2[%c0_8, %c0_9] : memref<8x32xf32, #tpu.memory_space<vmem>>, vector<8x32xf32>
    tpu.vector_store %arg2[%c0_8, %c0_9], %16 {strides = array<i32>} : memref<8x32xf32, #tpu.memory_space<vmem>>, vector<8x32xf32>,
    return
  }
  func.func @transform_0(%arg0: i32) -> (i32, i32) {
    %c0_i32 = arith.constant 0 : i32
    %c0_i32_0 = arith.constant 0 : i32
    return %arg0, %c0_i32 : i32, i32
  }
  func.func @transform_1(%arg0: i32) -> (i32, i32) {
    %c0_i32 = arith.constant 0 : i32
    %c0_i32_0 = arith.constant 0 : i32
    return %arg0, %c0_i32 : i32, i32
  }
}

</mosaic_0001>

<bundles_post_ra>
// kernel: tpu_custom_call.1
= control target key start
LH: loop header
LB: loop body
LE: loop exit
PB: predicated region body
PF: predicated region fallthrough
CT: control target
= control target key end

     0   :  { %6 = vsyncpa [#allocation3], 0  ;;  %s585_s0 = inlined_call_operand.hbm [shape: f32[20,256], index: 0, kind: input, shape index: {}]   ;;  %s586_s1 = inlined_call_operand.hbm [shape: f32[20,32], index: 1, kind: output, shape index: {}]  }
   0x1   :  { %8 = vsyncpa [#allocation3 + $0x1], 0 }
   0x2   :  { %9 = vsyncpa [#allocation4], 0 }
   0x3   :  { %11 = vsyncpa [#allocation4 + $0x1], 0  ;;  %s425_s6 = smov 0   ;;  %s427_s7 = smov 0  }
   0x4   :  { %s429_s8 = smov 0   ;;  %s431_s9 = smov 0  }
   0x5 LB: > { %s446_s10 = sadd.s32 4294967295, %s408_s9   ;;  %s249_s11 = sadd.s32 4294967294, %s408_s9   ;;  %s408_s9 = sphi %s431_s9, %s600_s9   ;;  %s404_s8 = sphi %s429_s8, %s599_s8   ;;  %s400_s7 = sphi %s427_s7, %s598_s7   ;;  %s396_s6 = sphi %s425_s6, %s597_s6  }
   0x6   : > { %s450_s12 = sadd.s32 1, %s408_s9   ;;  %s24_s13 = sadd.s32 1, %s404_s8 }
   0x7   : > { %s21_s14 = ssub.s32 %s408_s9, %s450_s12  ;;  %p31_p0 = scmp.ne.s32.totalorder %s404_s8, %s400_s7 }
   0x8   : > { %p22_p1 = scmp.eq.s32.totalorder %s21_s14, 0  ;;  %p32_p2 = scmp.eq.s32.totalorder %s408_s9, 0 }
   0x9   : > { %p37_p3 = scmp.ne.s32.totalorder %s400_s7, %s396_s6  ;;  %p38_p4 = scmp.eq.s32.totalorder %s446_s10, 0 }
   0xa   : > { %s462_s15 = scalar_select %p22_p1, %s404_s8, %s24_s13  }
   0xb   : > { %p464_p5 = por %p32_p2, %p31_p0  ;;  %p468_p6 = por %p38_p4, %p37_p3 }
   0xc   : > { %p61_p7 = scmp.eq.s32.totalorder %s446_s10, 2  ;;  %p67_p8 = scmp.eq.s32.totalorder %s249_s11, 2 }
   0xd   : > { %p275_p9 = scmp.lt.s32.totalorder %s408_s9, 3  ;;  %s87_s20 = sand.u32 1, %s404_s8  }
   0xe   : > { %p474_p10 = por %p61_p7, %p31_p0  ;;  %p478_p11 = por %p67_p8, %p37_p3 }
   0xf   : > { %s262_s21 = sshll.u32 %s408_s9, 8  ;;  %s252_s22 = sshll.u32 %s87_s20, 4 }
  0x10   : > { %s590_s18 = scalar_select %p474_p10, 1, 0 }
  0x11   : > { %s591_s19 = scalar_select %p478_p11, 1, 0 }
  0x12   : > { %s487_s25 = scalar_lea.hbm %s585_s0, %s262_s21  ;;  %s91_s26 = scalar_lea.vmem [#allocation2], %s252_s22 }
  0x13   : > { %s99_s27 = sshll.u32 %s91_s26, 4  ;;  %p491_p12 = pnand %p275_p9, %p464_p5  ;;  %s495_s27 = int_to_ptr.vmem [resolvable:$true] %s99_s27 }
  0x14   : > { %s88_s29 = scalar_lea.sflag [#allocation3], %s87_s20  ;;  %s312_s30 = scalar_lea.hbm %s487_s25, 256 }
  0x15   : > { %p313_p1 = scmp.ne.s32.totalorder %s487_s25, %s312_s30  ;;  %p314_p2 = pneg %p491_p12 }
  0x16   : > { %s317_s4 = scalar_lea.hbm %s585_s0, 768  ;;  %p318_p5 = scmp.lt.u32.totalorder %s487_s25, %s585_s0 }
  0x17   : > { %p315_p3 = pnand %p314_p2, %p313_p1  ;;  %p319_p7 = scmp.lt.u32.totalorder %s317_s4, %s312_s30 }
  0x18   : > { %p321_p9 = scmp.lt.u32.totalorder %s312_s30, %s487_s25 }
  0x19   : > { %p316_p4 = pneg %p315_p3  ;;  %p320_p8 = por %p319_p7, %p318_p5 }
  0x1b   : > { %p322_p13 = por %p321_p9, %p320_p8 }
  0x1d   : > { %p323_p0 = pnand %p322_p13, %p316_p4 }
  0x1f   : > { %326 = shalt.err (!%p323_p0)
}
  0x20   : > { %s327_s13 = scalar_lea.vmem %s495_s27, 256  ;;  %s410_s14 = smov [#allocation2]  }
  0x21   : > { %p328_p1 = scmp.ne.s32.totalorder %s495_s27, %s327_s13  ;;  %s332_s16 = sshll.u32 %s410_s14, 4  ;;  %s333_s16 = int_to_ptr.vmem [resolvable:$false] %s332_s16 }
  0x22   : > { %s334_s20 = scalar_lea.vmem %s333_s16, 512  ;;  %p335_p10 = scmp.lt.s32.totalorder %s495_s27, %s333_s16 }
  0x23   : > { %p330_p3 = pnand %p328_p1, %p314_p2  ;;  %p336_p5 = scmp.lt.s32.totalorder %s334_s20, %s327_s13 }
  0x25   : > { %p331_p11 = pneg %p330_p3  ;;  %p337_p7 = por %p336_p5, %p335_p10 }
  0x27   : > { %p338_p8 = pnand %p337_p7, %p331_p11 }
  0x29   : > { %341 = shalt.err (!%p338_p8)
}
  0x2a   : > { %270 = dma.hbm_to_vmem [thread:$0]  (!%p491_p12), %s487_s25, 256, %s495_s27, %s88_s29  }
  0x2b   : > { %p593_p13 = scmp.lt.s32.totalorder %s408_s9, 4  ;;  %p594_p0 = scmp.ge.s32.totalorder %s408_s9, 1 }
  0x2d   : > { %p105_p2 = pnand %p594_p0, %p593_p13 }
  0x2e   : > { %s529_s21 = sand.u32 (!%p105_p2), 1, %s400_s7  }
  0x2f   : > { %108 = sbr.rel (%p105_p2) target bundleno = 203 (0xcb), region = 24  ;;  %s256_s22 = sshll.u32 (!%p105_p2), %s529_s21, 4 }
  0x30   : > { %s111_s23 = scalar_lea.sflag (!%p105_p2), [#allocation3], %s529_s21  ;;  %s114_s24 = scalar_lea.vmem (!%p105_p2), [#allocation2], %s256_s22 }
  0x36   : > { %387 = dma.done.wait (%p468_p6), %s111_s23, 256  }
  0x37   : > { %389 = vsyncadd (%p468_p6), %s111_s23, 4294967040  ;;  %v133_v0 = vld [vmem:[%s114_s24] sm:$0xff]  ;;  %s411_s25 = smov 96   ;;  %s412_s26 = smov 32   ;;  %v147_v1 = vld [vmem:[%s114_s24 + $0x8] sm:$0xff]  ;;  %vm163_vm0 = vcmask 261120  }
  0x38   : > { %135 = vrot.lane.b32.xlu0 %v133_v0, %s411_s25  ;;  %143 = vrot.lane.b32.xlu1 %v133_v0, %s412_s26  ;;  %s413_s27 = smov 64   ;;  %s257_s17 = sshll.u32 %s529_s21, 3 }
  0x39   : > { %s259_s28 = sshll.u32 %s446_s10, 7  ;;  %s132_s29 = scalar_lea.vmem [#allocation5], %s257_s17 }
  0x3a   : > { %s179_s30 = sshll.u32 %s132_s29, 4  ;;  %s542_s4 = scalar_lea.hbm %s586_s1, %s259_s28  ;;  %s544_s30 = int_to_ptr.vmem [resolvable:$true] %s179_s30 }
  0x3b   : > { %s166_s5 = scalar_lea.sflag [#allocation4], %s529_s21  ;;  %s342_s11 = scalar_lea.vmem %s544_s30, 128 }
  0x3c   : > { %139 = vrot.lane.b32.xlu0 %v133_v0, %s413_s27  ;;  %150 = vrot.lane.b32.xlu1 %v147_v1, %s411_s25  ;;  %p343_p6 = scmp.ne.s32.totalorder %s544_s30, %s342_s11  ;;  %p595_p10 = scmp.ne.s32.totalorder %s590_s18, 0 }
  0x3d   : > { %s414_s10 = smov [#allocation5]  }
  0x3e   : > { %p344_p11 = pnand %p343_p6, %p595_p10  ;;  %s346_s13 = sshll.u32 %s414_s10, 4  ;;  %s347_s13 = int_to_ptr.vmem [resolvable:$false] %s346_s13 }
  0x3f   : > { %s348_s14 = scalar_lea.vmem %s347_s13, 256  ;;  %p349_p4 = scmp.lt.s32.totalorder %s544_s30, %s347_s13 }
  0x40   : > { %154 = vrot.lane.b32.xlu0 %v147_v1, %s413_s27  ;;  %158 = vrot.lane.b32.xlu1 %v147_v1, %s412_s26  ;;  %p345_p12 = pneg %p344_p11  ;;  %p350_p9 = scmp.lt.s32.totalorder %s348_s14, %s342_s11 }
  0x42   : > { %p351_p1 = por %p350_p9, %p349_p4 }
  0x44   : > { %p352_p3 = pnand %p351_p1, %p345_p12 }
  0xaa   : > { %v136_v2 = vpop.permute.xlu0 %135  ;;  %v144_v3 = vpop.permute.xlu1 %143 }
  0xab   : > { %v138_v4 = vadd.f32 %v136_v2, %v133_v0 }
  0xae   : > { %v140_v5 = vpop.permute.xlu0 %139  ;;  %v151_v7 = vpop.permute.xlu1 %150 }
  0xaf   : > { %v142_v6 = vadd.f32 %v140_v5, %v138_v4 }
  0xb1   : > { %v146_v8 = vadd.f32 %v144_v3, %v142_v6 }
  0xb2   : > { %v155_v10 = vpop.permute.xlu0 %154  ;;  %v159_v12 = vpop.permute.xlu1 %158 }
  0xb3   : > { %v148_v9 = vadd.f32 %v147_v1, %v146_v8 }
  0xb5   : > { %v153_v11 = vadd.f32 %v151_v7, %v148_v9 }
  0xb7   : > { %v157_v13 = vadd.f32 %v155_v10, %v153_v11 }
  0xb9   : > { %v161_v14 = vadd.f32 %v159_v12, %v157_v13 }
  0xbb   : > { %v162_v15 = vmul.f32 0.125, %v161_v14 }
  0xbd   : > { %164 = vst.msk [vmem:[%s132_s29] sm:$0xff] %vm163_vm0, %v162_v15 }
  0xbe   : > { %355 = shalt.err (!%p352_p3)
}
  0xbf   : > { %s356_s16 = scalar_lea.hbm %s542_s4, 128  ;;  %s360_s22 = scalar_lea.hbm %s586_s1, 384 }
  0xc0   : > { %p357_p5 = scmp.ne.s32.totalorder %s542_s4, %s356_s16  ;;  %p361_p13 = scmp.lt.u32.totalorder %s542_s4, %s586_s1 }
  0xc1   : > { %p362_p0 = scmp.lt.u32.totalorder %s360_s22, %s356_s16  ;;  %p364_p6 = scmp.lt.u32.totalorder %s356_s16, %s542_s4 }
  0xc2   : > { %p358_p7 = pnand %p357_p5, %p595_p10 }
  0xc3   : > { %p363_p2 = por %p362_p0, %p361_p13 }
  0xc4   : > { %p359_p8 = pneg %p358_p7 }
  0xc5   : > { %p365_p11 = por %p364_p6, %p363_p2 }
  0xc7   : > { %p366_p12 = pnand %p365_p11, %p359_p8 }
  0xc9   : > { %369 = shalt.err (!%p366_p12)
}
  0xca   : > { %265 = dma.vmem_to_hbm [thread:$0]  (%p595_p10), %s544_s30, 128, %s542_s4, %s166_s5  }
  0xcb PF: > { %p276_p4 = scmp.ge.s32.totalorder %s408_s9, 2  ;;  %s191_s25 = sand.u32 1, %s396_s6  }
  0xcc   : > { %p596_p9 = scmp.ne.s32.totalorder %s591_s19, 0  ;;  %s192_s26 = scalar_lea.sflag [#allocation4], %s191_s25 }
  0xce   : > { %p272_p1 = pnand %p276_p4, %p596_p9 }
  0xd0   : > { %391 = dma.done.wait (!%p272_p1), %s192_s26, 128  }
  0xd1   : > { %393 = vsyncadd (!%p272_p1), %s192_s26, 4294967168  ;;  %p14_p3 = scmp.ge.s32.totalorder %s450_s12, 5   ;;  %s597_s6 = smov %s400_s7 }
  0xd2   : > { %s598_s7 = smov %s404_s8  ;;  %s599_s8 = smov %s462_s15 }
  0xd3   : > { %s600_s9 = smov %s450_s12  ;;  %16 = sbr.rel (!%p14_p3) target bundleno = 5 (0x5), region = 69 }
  0xda   :  { %197 = vsyncpa [#allocation3], 1 }
  0xdb   :  { %199 = vsyncpa [#allocation3 + $0x1], 1 }
  0xdc   :  { %200 = vsyncpa [#allocation4], 1 }
  0xdd   :  { %202 = vsyncpa [#allocation4 + $0x1], 1 }

</bundles_post_ra>
